<compile_context>
chip_gen: v7x
topology: tpu7x:2x2x1
jax: 0.10.0
libtpu: 0.0.40
codegen_flags: <defaults>
</compile_context>

<pallas_src>
import functools

import jax
import jax.numpy as jnp
from jax.experimental import pallas as pl
from jax.experimental.pallas import tpu as pltpu

LN_EPS = 1e-5


# --------------------------------------------------------------------------- #
# Kernel
# --------------------------------------------------------------------------- #
def _patch_merge_kernel(x_ref, w_even_ref, w_odd_ref, bias_ref, o_ref, *, pm):
    """One grid step = `tm` row-pairs of the merged image.

    x_ref   : (tm, 2, W/2, 2C) raw tokens; axis 1 = image-row parity,
              last axis = [w-even | w-odd] * C channels.
    w_even  : (2C, 2Cout) bf16, LN gamma folded in (channels of [x0|x2]).
    w_odd   : (2C, 2Cout) bf16, LN gamma folded in (channels of [x1|x3]).
    bias    : (1, 2Cout) f32 (= beta @ W^T).
    o_ref   : (tm*W/2, 2Cout) output tokens.
    pm      : row-pairs per in-kernel chunk (static, divides tm).
    """
    tm, _, wh, c2 = x_ref.shape
    n_chunks = tm // pm
    rows_c = pm * wh
    inv_4c = 1.0 / (2.0 * c2)

    # Hoisted once per grid step (constant-index blocks, never re-DMA'd).
    w_even = w_even_ref[...]
    w_odd = w_odd_ref[...]
    bias = bias_ref[...]

    def chunk(k, carry):
        p0 = pl.multiple_of(k * pm, pm)
        xb = x_ref[pl.ds(p0, pm)]                                # (pm, 2, wh, 2C)
        # even slab = [x0 | x2] channels, odd slab = [x1 | x3] channels.
        # TODO(synk): for W/2 not a multiple of 8 this reshape may force a
        # sublane relayout; verify with a bundle dump before switching to a
        # 2-D row-view layout.
        ev = xb[:, 0, :, :].reshape(rows_c, c2).astype(jnp.float32)
        od = xb[:, 1, :, :].reshape(rows_c, c2).astype(jnp.float32)

        # One-pass LayerNorm stats over the virtual 4C vector (f32, biased var).
        s1 = (jnp.sum(ev, axis=-1, keepdims=True)
              + jnp.sum(od, axis=-1, keepdims=True))
        s2 = (jnp.sum(ev * ev, axis=-1, keepdims=True)
              + jnp.sum(od * od, axis=-1, keepdims=True))
        mean = s1 * inv_4c
        var = jnp.maximum(s2 * inv_4c - mean * mean, 0.0)   # guard f32 rounding
        inv = jax.lax.rsqrt(var + LN_EPS)

        # Normalize in f32, then drop to bf16 for the MXU (gamma is already
        # folded into the weights); accumulate in f32.
        ne = ((ev - mean) * inv).astype(jnp.bfloat16)
        no = ((od - mean) * inv).astype(jnp.bfloat16)
        acc = jnp.dot(ne, w_even, preferred_element_type=jnp.float32)
        acc = acc + jnp.dot(no, w_odd, preferred_element_type=jnp.float32)
        acc = acc + bias

        r0 = pl.multiple_of(k * rows_c, rows_c)
        o_ref[pl.ds(r0, rows_c), :] = acc.astype(o_ref.dtype)
        return carry

    jax.lax.fori_loop(0, n_chunks, chunk, 0, unroll=True)


# --------------------------------------------------------------------------- #
# Tiling heuristics
# --------------------------------------------------------------------------- #
def _tpu_vmem_plan():
    """(vmem_budget_bytes, vmem_limit_bytes, num_tensorcores) for this chip.

    Conservative defaults assume v7x (64 MiB VMEM, 2 TCs) if the query fails.
    """
    vmem_cap = 64 << 20
    num_cores = 2
    try:
        info = pltpu.get_tpu_info()
        cap = getattr(info, "vmem_capacity_bytes", None)
        if cap:
            vmem_cap = int(cap)
        for name in ("num_cores", "core_count", "num_tensorcores"):
            v = getattr(info, name, None)
            if v:
                num_cores = int(v)
                break
    except Exception:
        pass
    vmem_limit = max(32 << 20, min((vmem_cap * 3) // 4, 96 << 20))
    vmem_budget = (vmem_limit * 3) // 4
    return vmem_budget, vmem_limit, num_cores


def _choose_pm(tm, wh, chunk_rows_target=256):
    """Row-pairs per in-kernel chunk: ~256 rows, 8-aligned if possible."""
    cands = [d for d in range(1, tm + 1)
             if tm % d == 0 and d * wh <= chunk_rows_target]
    if not cands:
        return 1
    aligned = [d for d in cands if (d * wh) % 8 == 0]
    return max(aligned) if aligned else max(cands)


def _choose_tm(n_pairs, wh, c, in_dsize, out_dsize, *,
               vmem_budget, target_rows, min_steps, want_even_steps,
               chunk_rows_target=256):
    """Row-pairs per grid step, VMEM-budget-driven.

    The budget counts: double-buffered input + output blocks, single-buffered
    weight/bias blocks, and the in-kernel temporaries (ev/od/ne/no/acc + chunk
    view), bounded by the in-kernel chunk size.
    """
    c2 = 2 * c
    c_out = 2 * c
    # Fixed VMEM: weights (bf16, single-buffered) + bias + chunk temporaries.
    weight_bytes = 2 * (c2 * c_out * 2) + c_out * 4
    if wh <= chunk_rows_target:
        chunk_rows = max(wh, (chunk_rows_target // wh) * wh)
    else:
        chunk_rows = wh
    temp_bytes = chunk_rows * (c2 * (2 * 4 + 2 * 2)      # ev/od f32, ne/no bf16
                               + c_out * 4               # acc f32
                               + 2 * c2 * in_dsize)      # chunk view of x
    fixed = weight_bytes + temp_bytes
    # Double-buffered input + output blocks, per row-pair.
    per_pair = 2 * (2 * wh * c2 * in_dsize) + 2 * (wh * c_out * out_dsize)
    avail = max(vmem_budget - fixed, per_pair)
    cap = min(max(1, avail // per_pair),
              max(1, target_rows // wh),
              n_pairs)

    divs = [d for d in range(1, n_pairs + 1) if n_pairs % d == 0]
    cands = [d for d in divs if d <= cap and (d * wh) % 8 == 0]
    if not cands:
        # TODO(synk): W/2 not 8-aligned at any divisor -> one full-array block
        # (always layout-legal); consider a 2-D row-view layout for such shapes.
        return n_pairs

    good = [d for d in cands
            if n_pairs // d >= min_steps
            and (not want_even_steps or (n_pairs // d) % 2 == 0)]
    if good:
        return max(good)
    good = [d for d in cands if n_pairs // d >= 2]
    return max(good) if good else max(cands)


# --------------------------------------------------------------------------- #
# pallas_call builder + wrapper
# --------------------------------------------------------------------------- #
def _build_pallas_call(x_dtype, rows, c2, c_out, tm, wh, grid, pm, vmem_limit,
                       single_buffer_consts):
    kernel = functools.partial(_patch_merge_kernel, pm=pm)

    def const_spec(shape):
        idx = lambda i: (0,) * len(shape)
        if single_buffer_consts:
            # Constant index_map -> never re-DMAs; single buffer halves its
            # VMEM footprint at zero cost.
            return pl.BlockSpec(shape, idx, pipeline_mode=pl.Buffered(1))
        return pl.BlockSpec(shape, idx)

    # NOTE: for production configs keep 2*C a multiple of 128 so the output
    # stores stay lane-dense (unmasked vst).
    return pl.pallas_call(
        kernel,
        out_shape=jax.ShapeDtypeStruct((rows, c_out), x_dtype),
        grid_spec=pltpu.PrefetchScalarGridSpec(
            num_scalar_prefetch=0,
            grid=grid,
            in_specs=[
                pl.BlockSpec((tm, 2, wh, c2), lambda i: (i, 0, 0, 0)),
                const_spec((c2, c_out)),
                const_spec((c2, c_out)),
                const_spec((1, c_out)),
            ],
            out_specs=pl.BlockSpec((tm * wh, c_out), lambda i: (i, 0)),
        ),
        compiler_params=pltpu.CompilerParams(
            dimension_semantics=("parallel",),
            vmem_limit_bytes=vmem_limit,
        ),
    )


def patch_merging_pallas(x, input_resolution, gamma, beta, w_reduction, *, tm=None):
    """Forward pass of PatchMerging.

    Args:
      x: (B, H*W, C) tokens (f32 or bf16; bf16 halves HBM traffic).
      input_resolution: (H, W).
      gamma, beta: (4*C,) LayerNorm affine params.
      w_reduction: (2*C, 4*C) Linear weight (PyTorch layout: out, in).

    Returns:
      (B, H/2 * W/2, 2*C), same dtype as x.
    """
    H, W = input_resolution
    B, L, C = x.shape
    assert L == H * W, "input feature has wrong size"
    assert H % 2 == 0 and W % 2 == 0, f"x size ({H}*{W}) are not even."

    hh = H // 2
    wh = W // 2
    c2 = 2 * C          # width of the even / odd slabs ([w-even | w-odd] * C)
    c_out = 2 * C       # output channels
    n_pairs = B * hh    # one "pair" = two consecutive image rows
    rows = n_pairs * wh # total output tokens

    # Free view (no HBM copy): (b, hh, ph, ww, pw, c) -> (b*hh, ph, ww, pw*c).
    x4 = x.reshape(n_pairs, 2, wh, c2)

    # Fold LN affine into the reduction weight, rearranged to match the
    # even ([x0|x2]) / odd ([x1|x3]) slab layout.  Done once in the wrapper.
    w_t = jnp.transpose(w_reduction).astype(jnp.float32)          # (4C, 2C)
    w_aff = gamma.astype(jnp.float32)[:, None] * w_t              # gamma folded
    bias = (beta.astype(jnp.float32) @ w_t).reshape(1, c_out)     # beta folded
    w_even = jnp.concatenate([w_aff[0:C], w_aff[2 * C:3 * C]], axis=0)
    w_odd = jnp.concatenate([w_aff[C:2 * C], w_aff[3 * C:4 * C]], axis=0)
    w_even = w_even.astype(jnp.bfloat16)                          # (2C, 2C)
    w_odd = w_odd.astype(jnp.bfloat16)

    in_dsize = jnp.dtype(x.dtype).itemsize
    out_dsize = in_dsize

    vmem_budget, vmem_limit, num_cores = _tpu_vmem_plan()
    target_rows = 1024 if vmem_budget >= (48 << 20) else 512
    if tm is None:
        tm = _choose_tm(n_pairs, wh, C, in_dsize, out_dsize,
                        vmem_budget=vmem_budget, target_rows=target_rows,
                        min_steps=max(2, 2 * num_cores),
                        want_even_steps=(num_cores >= 2))
    assert n_pairs % tm == 0, "row-pair count must be divisible by the tile"
    assert (tm * wh) % 8 == 0 or tm == n_pairs, \
        "row tile must be 8-aligned (or a single full block)"

    pm = _choose_pm(tm, wh)
    grid = (n_pairs // tm,)

    try:
        out = _build_pallas_call(x.dtype, rows, c2, c_out, tm, wh, grid, pm,
                                 vmem_limit, True)(x4, w_even, w_odd, bias)
    except Exception:
        # Fallback for JAX versions where single-buffered constant blocks
        # (pipeline_mode=pl.Buffered(1)) are unavailable / rejected.
        out = _build_pallas_call(x.dtype, rows, c2, c_out, tm, wh, grid, pm,
                                 vmem_limit, False)(x4, w_even, w_odd, bias)

    return out.reshape(B, hh * wh, c_out)


# --------------------------------------------------------------------------- #
# Pure-JAX reference
# --------------------------------------------------------------------------- #
def patch_merging_ref(x, input_resolution, gamma, beta, w_reduction):
    """Pure-JAX f32 reference mirroring the PyTorch forward."""
    H, W = input_resolution
    B, L, C = x.shape
    xg = x.reshape(B, H, W, C)
    x0 = xg[:, 0::2, 0::2, :]
    x1 = xg[:, 1::2, 0::2, :]
    x2 = xg[:, 0::2, 1::2, :]
    x3 = xg[:, 1::2, 1::2, :]
    xm = jnp.concatenate([x0, x1, x2, x3], axis=-1).reshape(B, -1, 4 * C)
    xm = xm.astype(jnp.float32)
    mean = jnp.mean(xm, axis=-1, keepdims=True)
    var = jnp.mean((xm - mean) ** 2, axis=-1, keepdims=True)
    xn = (xm - mean) * jax.lax.rsqrt(var + LN_EPS)
    y = xn * gamma.astype(jnp.float32) + beta.astype(jnp.float32)
    return (y @ w_reduction.astype(jnp.float32).T).astype(x.dtype)


if __name__ == "__main__":
    # Small deterministic config: dim=32, resolution 16x16, batch 2.
    dim = 32
    H = W = 16
    B = 2

    key = jax.random.PRNGKey(0)
    kx, kw, kg, kb = jax.random.split(key, 4)

    x = jax.random.normal(kx, (B, H * W, dim), dtype=jnp.float32)
    gamma = 1.0 + 0.1 * jax.random.normal(kg, (4 * dim,), dtype=jnp.float32)
    beta = 0.1 * jax.random.normal(kb, (4 * dim,), dtype=jnp.float32)
    # nn.Linear(4*dim, 2*dim, bias=False) weight: (out, in)
    w_reduction = jax.random.normal(kw, (2 * dim, 4 * dim), dtype=jnp.float32) * 0.02

    # f32 path (dtype-preserving, matches the PyTorch module).
    out = patch_merging_pallas(x, (H, W), gamma, beta, w_reduction)
    out = jax.block_until_ready(out)
    ref = patch_merging_ref(x, (H, W), gamma, beta, w_reduction)
    assert out.shape == (B, (H // 2) * (W // 2), 2 * dim), out.shape
    err = float(jnp.max(jnp.abs(out.astype(jnp.float32) - ref.astype(jnp.float32))))
    # bf16 MXU matmul + folded affine -> small rounding diff vs f32 reference.
    assert err < 3e-2, err

    # bf16 I/O path (memory-bound merge stages: halve HBM bytes per token).
    xb = x.astype(jnp.bfloat16)
    out_b = patch_merging_pallas(xb, (H, W), gamma, beta, w_reduction)
    out_b = jax.block_until_ready(out_b)
    ref_b = patch_merging_ref(xb.astype(jnp.float32), (H, W), gamma, beta,
                              w_reduction)
    err_b = float(jnp.max(jnp.abs(out_b.astype(jnp.float32) - ref_b)))
    assert err_b < 6e-2, err_b

    print("KERNEL_OK")
</pallas_src>

<mosaic_0001>
module attributes {stable_mosaic.version = 11 : i64} {
  func.func @_patch_merge_kernel(%arg0: i32, %arg1: memref<4x2x8x64xf32, #tpu.memory_space<vmem>>, %arg2: memref<64x64xbf16, #tpu.memory_space<vmem>>, %arg3: memref<64x64xbf16, #tpu.memory_space<vmem>>, %arg4: memref<1x64xf32, #tpu.memory_space<vmem>>, %arg5: memref<32x64xf32, #tpu.memory_space<vmem>>) attributes {dimension_semantics = [#tpu.dimension_semantics<parallel>], iteration_bounds = array<i64: 4>, scalar_prefetch = 0 : i64, scratch_operands = 0 : i64, tpu.core_type = #tpu.core_type<tc>, window_params = [{transform_indices = @transform_0, window_bounds = array<i64: 4, 2, 8, 64>}, {pipeline_mode = #tpu.pipeline_mode<synchronous>, transform_indices = @transform_1, window_bounds = array<i64: 64, 64>}, {pipeline_mode = #tpu.pipeline_mode<synchronous>, transform_indices = @transform_2, window_bounds = array<i64: 64, 64>}, {pipeline_mode = #tpu.pipeline_mode<synchronous>, transform_indices = @transform_3, window_bounds = array<i64: 1, 64>}, {transform_indices = @transform_4, window_bounds = array<i64: 32, 64>}]} {
    %c0 = arith.constant 0 : index
    %c0_0 = arith.constant 0 : index
    %0 = vector.load %arg2[%c0, %c0_0] : memref<64x64xbf16, #tpu.memory_space<vmem>>, vector<64x64xbf16>
    %c0_1 = arith.constant 0 : index
    %c0_2 = arith.constant 0 : index
    %1 = vector.load %arg3[%c0_1, %c0_2] : memref<64x64xbf16, #tpu.memory_space<vmem>>, vector<64x64xbf16>
    %c0_3 = arith.constant 0 : index
    %c0_4 = arith.constant 0 : index
    %2 = vector.load %arg4[%c0_3, %c0_4] : memref<1x64xf32, #tpu.memory_space<vmem>>, vector<1x64xf32>
    %c0_i32 = arith.constant 0 : i32
    %c4_i32 = arith.constant 4 : i32
    %3 = arith.muli %c0_i32, %c4_i32 : i32
    %4 = tpu.assume_multiple %3, 4 : i32
    %5 = arith.index_cast %4 : i32 to index
    %c0_5 = arith.constant 0 : index
    %c0_6 = arith.constant 0 : index
    %c0_7 = arith.constant 0 : index
    %6 = vector.load %arg1[%5, %c0_5, %c0_6, %c0_7] : memref<4x2x8x64xf32, #tpu.memory_space<vmem>>, vector<4x2x8x64xf32>
    %7 = vector.extract_strided_slice %6 {offsets = [0, 0, 0, 0], sizes = [4, 1, 8, 64], strides = [1, 1, 1, 1]} : vector<4x2x8x64xf32> to vector<4x1x8x64xf32>
    %8 = vector.shape_cast %7 : vector<4x1x8x64xf32> to vector<4x8x64xf32>
    %9 = vector.shape_cast %8 : vector<4x8x64xf32> to vector<32x64xf32>
    %10 = vector.extract_strided_slice %6 {offsets = [0, 1, 0, 0], sizes = [4, 1, 8, 64], strides = [1, 1, 1, 1]} : vector<4x2x8x64xf32> to vector<4x1x8x64xf32>
    %11 = vector.shape_cast %10 : vector<4x1x8x64xf32> to vector<4x8x64xf32>
    %12 = vector.shape_cast %11 : vector<4x8x64xf32> to vector<32x64xf32>
    %cst = arith.constant dense<0.000000e+00> : vector<32xf32>
    %13 = vector.multi_reduction <add>, %9, %cst [1] : vector<32x64xf32> to vector<32xf32>
    %14 = vector.shape_cast %13 : vector<32xf32> to vector<32x1xf32>
    %cst_8 = arith.constant dense<0.000000e+00> : vector<32xf32>
    %15 = vector.multi_reduction <add>, %12, %cst_8 [1] : vector<32x64xf32> to vector<32xf32>
    %16 = vector.shape_cast %15 : vector<32xf32> to vector<32x1xf32>
    %17 = arith.addf %14, %16 : vector<32x1xf32>
    %18 = arith.mulf %9, %9 : vector<32x64xf32>
    %cst_9 = arith.constant dense<0.000000e+00> : vector<32xf32>
    %19 = vector.multi_reduction <add>, %18, %cst_9 [1] : vector<32x64xf32> to vector<32xf32>
    %20 = vector.shape_cast %19 : vector<32xf32> to vector<32x1xf32>
    %21 = arith.mulf %12, %12 : vector<32x64xf32>
    %cst_10 = arith.constant dense<0.000000e+00> : vector<32xf32>
    %22 = vector.multi_reduction <add>, %21, %cst_10 [1] : vector<32x64xf32> to vector<32xf32>
    %23 = vector.shape_cast %22 : vector<32xf32> to vector<32x1xf32>
    %24 = arith.addf %20, %23 : vector<32x1xf32>
    %cst_11 = arith.constant 7.812500e-03 : f32
    %25 = vector.broadcast %cst_11 : f32 to vector<32x1xf32>
    %26 = arith.mulf %17, %25 : vector<32x1xf32>
    %cst_12 = arith.constant 7.812500e-03 : f32
    %27 = vector.broadcast %cst_12 : f32 to vector<32x1xf32>
    %28 = arith.mulf %24, %27 : vector<32x1xf32>
    %29 = arith.mulf %26, %26 : vector<32x1xf32>
    %30 = arith.subf %28, %29 : vector<32x1xf32>
    %cst_13 = arith.constant 0.000000e+00 : f32
    %31 = vector.broadcast %cst_13 : f32 to vector<32x1xf32>
    %32 = arith.maximumf %30, %31 : vector<32x1xf32>
    %cst_14 = arith.constant 9.99999974E-6 : f32
    %33 = vector.broadcast %cst_14 : f32 to vector<32x1xf32>
    %34 = arith.addf %32, %33 : vector<32x1xf32>
    %35 = math.rsqrt %34 : vector<32x1xf32>
    %36 = vector.broadcast %26 : vector<32x1xf32> to vector<32x64xf32>
    %37 = arith.subf %9, %36 : vector<32x64xf32>
    %38 = vector.broadcast %35 : vector<32x1xf32> to vector<32x64xf32>
    %39 = arith.mulf %37, %38 : vector<32x64xf32>
    %40 = arith.truncf %39 : vector<32x64xf32> to vector<32x64xbf16>
    %41 = vector.broadcast %26 : vector<32x1xf32> to vector<32x64xf32>
    %42 = arith.subf %12, %41 : vector<32x64xf32>
    %43 = vector.broadcast %35 : vector<32x1xf32> to vector<32x64xf32>
    %44 = arith.mulf %42, %43 : vector<32x64xf32>
    %45 = arith.truncf %44 : vector<32x64xf32> to vector<32x64xbf16>
    %cst_15 = arith.constant dense<0.000000e+00> : vector<32x64xf32>
    %46 = tpu.matmul %40, %0, %cst_15 {dimension_numbers = #tpu.dot_dimension_numbers<[1], [0], [0], [1], [0, 0, 1, 1], [], []>} : vector<32x64xbf16>, vector<64x64xbf16>, vector<32x64xf32> -> vector<32x64xf32>
    %cst_16 = arith.constant dense<0.000000e+00> : vector<32x64xf32>
    %47 = tpu.matmul %45, %1, %cst_16 {dimension_numbers = #tpu.dot_dimension_numbers<[1], [0], [0], [1], [0, 0, 1, 1], [], []>} : vector<32x64xbf16>, vector<64x64xbf16>, vector<32x64xf32> -> vector<32x64xf32>
    %48 = arith.addf %46, %47 : vector<32x64xf32>
    %49 = vector.broadcast %2 : vector<1x64xf32> to vector<32x64xf32>
    %50 = arith.addf %48, %49 : vector<32x64xf32>
    %c32_i32 = arith.constant 32 : i32
    %51 = arith.muli %c0_i32, %c32_i32 : i32
    %52 = tpu.assume_multiple %51, 32 : i32
    %53 = arith.index_cast %52 : i32 to index
    %c0_17 = arith.constant 0 : index
    %54 = vector.load %arg5[%53, %c0_17] : memref<32x64xf32, #tpu.memory_space<vmem>>, vector<32x64xf32>
    tpu.vector_store %arg5[%53, %c0_17], %50 {strides = array<i32>} : memref<32x64xf32, #tpu.memory_space<vmem>>, vector<32x64xf32>,
    %c1_i32 = arith.constant 1 : i32
    return
  }
  func.func @transform_0(%arg0: i32) -> (i32, i32, i32, i32) {
    %c0_i32 = arith.constant 0 : i32
    %c0_i32_0 = arith.constant 0 : i32
    %c0_i32_1 = arith.constant 0 : i32
    %c0_i32_2 = arith.constant 0 : i32
    return %arg0, %c0_i32, %c0_i32_0, %c0_i32_1 : i32, i32, i32, i32
  }
  func.func @transform_1(%arg0: i32) -> (i32, i32) {
    %c0_i32 = arith.constant 0 : i32
    %c0_i32_0 = arith.constant 0 : i32
    %c0_i32_1 = arith.constant 0 : i32
    return %c0_i32, %c0_i32_0 : i32, i32
  }
  func.func @transform_2(%arg0: i32) -> (i32, i32) {
    %c0_i32 = arith.constant 0 : i32
    %c0_i32_0 = arith.constant 0 : i32
    %c0_i32_1 = arith.constant 0 : i32
    return %c0_i32, %c0_i32_0 : i32, i32
  }
  func.func @transform_3(%arg0: i32) -> (i32, i32) {
    %c0_i32 = arith.constant 0 : i32
    %c0_i32_0 = arith.constant 0 : i32
    %c0_i32_1 = arith.constant 0 : i32
    return %c0_i32, %c0_i32_0 : i32, i32
  }
  func.func @transform_4(%arg0: i32) -> (i32, i32) {
    %c0_i32 = arith.constant 0 : i32
    %c0_i32_0 = arith.constant 0 : i32
    return %arg0, %c0_i32 : i32, i32
  }
}

module attributes {stable_mosaic.version = 11 : i64} {
  func.func @_patch_merge_kernel(%arg0: i32, %arg1: memref<4x2x8x64xf32, #tpu.memory_space<vmem>>, %arg2: memref<64x64xbf16, #tpu.memory_space<vmem>>, %arg3: memref<64x64xbf16, #tpu.memory_space<vmem>>, %arg4: memref<1x64xf32, #tpu.memory_space<vmem>>, %arg5: memref<32x64xf32, #tpu.memory_space<vmem>>) attributes {dimension_semantics = [#tpu.dimension_semantics<parallel>], iteration_bounds = array<i64: 4>, scalar_prefetch = 0 : i64, scratch_operands = 0 : i64, tpu.core_type = #tpu.core_type<tc>, window_params = [{transform_indices = @transform_0, window_bounds = array<i64: 4, 2, 8, 64>}, {pipeline_mode = #tpu.pipeline_mode<synchronous>, transform_indices = @transform_1, window_bounds = array<i64: 64, 64>}, {pipeline_mode = #tpu.pipeline_mode<synchronous>, transform_indices = @transform_2, window_bounds = array<i64: 64, 64>}, {pipeline_mode = #tpu.pipeline_mode<synchronous>, transform_indices = @transform_3, window_bounds = array<i64: 1, 64>}, {transform_indices = @transform_4, window_bounds = array<i64: 32, 64>}]} {
    %c0 = arith.constant 0 : index
    %c0_0 = arith.constant 0 : index
    %0 = vector.load %arg2[%c0, %c0_0] : memref<64x64xbf16, #tpu.memory_space<vmem>>, vector<64x64xbf16>
    %c0_1 = arith.constant 0 : index
    %c0_2 = arith.constant 0 : index
    %1 = vector.load %arg3[%c0_1, %c0_2] : memref<64x64xbf16, #tpu.memory_space<vmem>>, vector<64x64xbf16>
    %c0_3 = arith.constant 0 : index
    %c0_4 = arith.constant 0 : index
    %2 = vector.load %arg4[%c0_3, %c0_4] : memref<1x64xf32, #tpu.memory_space<vmem>>, vector<1x64xf32>
    %c0_i32 = arith.constant 0 : i32
    %c4_i32 = arith.constant 4 : i32
    %3 = arith.muli %c0_i32, %c4_i32 : i32
    %4 = tpu.assume_multiple %3, 4 : i32
    %5 = arith.index_cast %4 : i32 to index
    %c0_5 = arith.constant 0 : index
    %c0_6 = arith.constant 0 : index
    %c0_7 = arith.constant 0 : index
    %6 = vector.load %arg1[%5, %c0_5, %c0_6, %c0_7] : memref<4x2x8x64xf32, #tpu.memory_space<vmem>>, vector<4x2x8x64xf32>
    %7 = vector.extract_strided_slice %6 {offsets = [0, 0, 0, 0], sizes = [4, 1, 8, 64], strides = [1, 1, 1, 1]} : vector<4x2x8x64xf32> to vector<4x1x8x64xf32>
    %8 = vector.shape_cast %7 : vector<4x1x8x64xf32> to vector<4x8x64xf32>
    %9 = vector.shape_cast %8 : vector<4x8x64xf32> to vector<32x64xf32>
    %10 = vector.extract_strided_slice %6 {offsets = [0, 1, 0, 0], sizes = [4, 1, 8, 64], strides = [1, 1, 1, 1]} : vector<4x2x8x64xf32> to vector<4x1x8x64xf32>
    %11 = vector.shape_cast %10 : vector<4x1x8x64xf32> to vector<4x8x64xf32>
    %12 = vector.shape_cast %11 : vector<4x8x64xf32> to vector<32x64xf32>
    %cst = arith.constant dense<0.000000e+00> : vector<32xf32>
    %13 = vector.multi_reduction <add>, %9, %cst [1] : vector<32x64xf32> to vector<32xf32>
    %14 = vector.shape_cast %13 : vector<32xf32> to vector<32x1xf32>
    %cst_8 = arith.constant dense<0.000000e+00> : vector<32xf32>
    %15 = vector.multi_reduction <add>, %12, %cst_8 [1] : vector<32x64xf32> to vector<32xf32>
    %16 = vector.shape_cast %15 : vector<32xf32> to vector<32x1xf32>
    %17 = arith.addf %14, %16 : vector<32x1xf32>
    %18 = arith.mulf %9, %9 : vector<32x64xf32>
    %cst_9 = arith.constant dense<0.000000e+00> : vector<32xf32>
    %19 = vector.multi_reduction <add>, %18, %cst_9 [1] : vector<32x64xf32> to vector<32xf32>
    %20 = vector.shape_cast %19 : vector<32xf32> to vector<32x1xf32>
    %21 = arith.mulf %12, %12 : vector<32x64xf32>
    %cst_10 = arith.constant dense<0.000000e+00> : vector<32xf32>
    %22 = vector.multi_reduction <add>, %21, %cst_10 [1] : vector<32x64xf32> to vector<32xf32>
    %23 = vector.shape_cast %22 : vector<32xf32> to vector<32x1xf32>
    %24 = arith.addf %20, %23 : vector<32x1xf32>
    %cst_11 = arith.constant 7.812500e-03 : f32
    %25 = vector.broadcast %cst_11 : f32 to vector<32x1xf32>
    %26 = arith.mulf %17, %25 : vector<32x1xf32>
    %cst_12 = arith.constant 7.812500e-03 : f32
    %27 = vector.broadcast %cst_12 : f32 to vector<32x1xf32>
    %28 = arith.mulf %24, %27 : vector<32x1xf32>
    %29 = arith.mulf %26, %26 : vector<32x1xf32>
    %30 = arith.subf %28, %29 : vector<32x1xf32>
    %cst_13 = arith.constant 0.000000e+00 : f32
    %31 = vector.broadcast %cst_13 : f32 to vector<32x1xf32>
    %32 = arith.maximumf %30, %31 : vector<32x1xf32>
    %cst_14 = arith.constant 9.99999974E-6 : f32
    %33 = vector.broadcast %cst_14 : f32 to vector<32x1xf32>
    %34 = arith.addf %32, %33 : vector<32x1xf32>
    %35 = math.rsqrt %34 : vector<32x1xf32>
    %36 = vector.broadcast %26 : vector<32x1xf32> to vector<32x64xf32>
    %37 = arith.subf %9, %36 : vector<32x64xf32>
    %38 = vector.broadcast %35 : vector<32x1xf32> to vector<32x64xf32>
    %39 = arith.mulf %37, %38 : vector<32x64xf32>
    %40 = arith.truncf %39 : vector<32x64xf32> to vector<32x64xbf16>
    %41 = vector.broadcast %26 : vector<32x1xf32> to vector<32x64xf32>
    %42 = arith.subf %12, %41 : vector<32x64xf32>
    %43 = vector.broadcast %35 : vector<32x1xf32> to vector<32x64xf32>
    %44 = arith.mulf %42, %43 : vector<32x64xf32>
    %45 = arith.truncf %44 : vector<32x64xf32> to vector<32x64xbf16>
    %cst_15 = arith.constant dense<0.000000e+00> : vector<32x64xf32>
    %46 = tpu.matmul %40, %0, %cst_15 {dimension_numbers = #tpu.dot_dimension_numbers<[1], [0], [0], [1], [0, 0, 1, 1], [], []>} : vector<32x64xbf16>, vector<64x64xbf16>, vector<32x64xf32> -> vector<32x64xf32>
    %cst_16 = arith.constant dense<0.000000e+00> : vector<32x64xf32>
    %47 = tpu.matmul %45, %1, %cst_16 {dimension_numbers = #tpu.dot_dimension_numbers<[1], [0], [0], [1], [0, 0, 1, 1], [], []>} : vector<32x64xbf16>, vector<64x64xbf16>, vector<32x64xf32> -> vector<32x64xf32>
    %48 = arith.addf %46, %47 : vector<32x64xf32>
    %49 = vector.broadcast %2 : vector<1x64xf32> to vector<32x64xf32>
    %50 = arith.addf %48, %49 : vector<32x64xf32>
    %c32_i32 = arith.constant 32 : i32
    %51 = arith.muli %c0_i32, %c32_i32 : i32
    %52 = tpu.assume_multiple %51, 32 : i32
    %53 = arith.index_cast %52 : i32 to index
    %c0_17 = arith.constant 0 : index
    %54 = vector.load %arg5[%53, %c0_17] : memref<32x64xf32, #tpu.memory_space<vmem>>, vector<32x64xf32>
    tpu.vector_store %arg5[%53, %c0_17], %50 {strides = array<i32>} : memref<32x64xf32, #tpu.memory_space<vmem>>, vector<32x64xf32>,
    %c1_i32 = arith.constant 1 : i32
    return
  }
  func.func @transform_0(%arg0: i32) -> (i32, i32, i32, i32) {
    %c0_i32 = arith.constant 0 : i32
    %c0_i32_0 = arith.constant 0 : i32
    %c0_i32_1 = arith.constant 0 : i32
    %c0_i32_2 = arith.constant 0 : i32
    return %arg0, %c0_i32, %c0_i32_0, %c0_i32_1 : i32, i32, i32, i32
  }
  func.func @transform_1(%arg0: i32) -> (i32, i32) {
    %c0_i32 = arith.constant 0 : i32
    %c0_i32_0 = arith.constant 0 : i32
    %c0_i32_1 = arith.constant 0 : i32
    return %c0_i32, %c0_i32_0 : i32, i32
  }
  func.func @transform_2(%arg0: i32) -> (i32, i32) {
    %c0_i32 = arith.constant 0 : i32
    %c0_i32_0 = arith.constant 0 : i32
    %c0_i32_1 = arith.constant 0 : i32
    return %c0_i32, %c0_i32_0 : i32, i32
  }
  func.func @transform_3(%arg0: i32) -> (i32, i32) {
    %c0_i32 = arith.constant 0 : i32
    %c0_i32_0 = arith.constant 0 : i32
    %c0_i32_1 = arith.constant 0 : i32
    return %c0_i32, %c0_i32_0 : i32, i32
  }
  func.func @transform_4(%arg0: i32) -> (i32, i32) {
    %c0_i32 = arith.constant 0 : i32
    %c0_i32_0 = arith.constant 0 : i32
    return %arg0, %c0_i32 : i32, i32
  }
}

</mosaic_0001>

<bundles_post_ra>
// kernel: tpu_custom_call.1
= control target key start
LH: loop header
LB: loop body
LE: loop exit
PB: predicated region body
PF: predicated region fallthrough
CT: control target
= control target key end

     0   :  { %9 = vsyncpa [#allocation3], 0  ;;  %s1213_s0 = inlined_call_operand.hbm [shape: f32[16,2,8,64], index: 0, kind: input, shape index: {}]   ;;  %s1214_s1 = inlined_call_operand.hbm [shape: bf16[64,64], index: 1, kind: input, shape index: {}]   ;;  %s1215_s2 = inlined_call_operand.hbm [shape: bf16[64,64], index: 2, kind: input, shape index: {}]   ;;  %s1216_s3 = inlined_call_operand.vmem [shape: f32[1,64], index: 3, kind: input, shape index: {}]   ;;  %s1217_s4 = inlined_call_operand.vmem [shape: f32[128,64], index: 4, kind: output, shape index: {}]  }
   0x1   :  { %11 = vsyncpa [#allocation3 + $0x1], 0 }
   0x2   :  { %12 = vsyncpa [#allocation5], 0  ;;  %s960_s15 = smov 0   ;;  %s962_s16 = smov 0  }
   0x3   :  { %s964_s17 = smov 0   ;;  %s966_s18 = smov 0  }
   0x4 LB: > { %s649_s19 = sadd.s32 4294967295, %s926_s18   ;;  %p38_p0 = scmp.ne.s32.totalorder %s918_s16, %s914_s15  ;;  %s926_s18 = sphi %s966_s18, %s1233_s18   ;;  %s922_s17 = sphi %s964_s17, %s1232_s17   ;;  %s918_s16 = sphi %s962_s16, %s1231_s16   ;;  %s914_s15 = sphi %s960_s15, %s1230_s15  }
   0x5   : > { %p982_p1 = scmp.eq.s32.totalorder %s649_s19, 0  ;;  %p651_p2 = scmp.ge.s32.totalorder %s926_s18, 1 }
   0x6   : > { %p138_p3 = scmp.lt.s32.totalorder %s926_s18, 5  ;;  %s928_s23 = smov [#allocation4]  }
   0x7   : > { %s1222_s20 = scalar_select %p982_p1, 1, 0 }
   0x8   : > { %p990_p4 = por %p982_p1, %p38_p0  ;;  %p994_p5 = pnand %p651_p2, %p138_p3 }
   0x9   : > { %s150_s24 = sshll.u32 %s928_s23, 4  ;;  %s929_s26 = smov [#allocation6]   ;;  %s151_s24 = int_to_ptr.vmem [resolvable:$true] %s150_s24 }
   0xa   : > { %s1223_s21 = scalar_select %p990_p4, 1, 0 }
   0xb   : > { %s1224_s22 = scalar_select %p994_p5, 1, 0 }
   0xc   : > { %p732_p6 = pneg %p994_p5  ;;  %s163_s27 = sshll.u32 %s929_s26, 4  ;;  %s1006_s27 = int_to_ptr.vmem [resolvable:$true] %s163_s27 }
   0xd   : > { %s802_s30 = scalar_lea.hbm %s1214_s1, 512 }
   0xe   : > { %p1002_p7 = pnand %p732_p6, %p982_p1  ;;  %p803_p8 = scmp.ne.s32.totalorder %s1214_s1, %s802_s30 }
   0xf   : > { %p809_p12 = scmp.lt.u32.totalorder %s802_s30, %s1214_s1 }
  0x10   : > { %p804_p9 = pneg %p1002_p7 }
  0x12   : > { %p805_p10 = pnand %p804_p9, %p803_p8 }
  0x14   : > { %p806_p11 = pneg %p805_p10 }
  0x16   : > { %p811_p13 = pnand %p809_p12, %p806_p11 }
  0x18   : > { %814 = shalt.err (!%p811_p13)
}
  0x19   : > { %s815_s9 = scalar_lea.vmem %s151_s24, 512  ;;  %p823_p6 = scmp.lt.s32.totalorder %s151_s24, %s151_s24 }
  0x1a   : > { %p816_p0 = scmp.ne.s32.totalorder %s151_s24, %s815_s9  ;;  %p824_p1 = scmp.lt.s32.totalorder %s815_s9, %s815_s9 }
  0x1c   : > { %p818_p2 = pnand %p816_p0, %p804_p9  ;;  %p825_p4 = por %p824_p1, %p823_p6 }
  0x1e   : > { %p819_p3 = pneg %p818_p2 }
  0x20   : > { %p826_p5 = pnand %p825_p4, %p819_p3 }
  0x22   : > { %829 = shalt.err (!%p826_p5)
}
  0x23   : > { %s930_s10 = smov 64   ;;  %s931_s11 = smov 4  }
  0x24   : > { %735 = dma.hbm_to_vmem [thread:$0]  (!%p1002_p7), %s1214_s1, 512, %s151_s24, [#allocation5], %s930_s10, %s930_s10, %s931_s11  }
  0x25   : > { %s830_s23 = scalar_lea.hbm %s1215_s2, 512 }
  0x26   : > { %p831_p8 = scmp.ne.s32.totalorder %s1215_s2, %s830_s23  ;;  %p837_p5 = scmp.lt.u32.totalorder %s830_s23, %s1215_s2 }
  0x28   : > { %p833_p1 = pnand %p831_p8, %p804_p9 }
  0x2a   : > { %p834_p4 = pneg %p833_p1 }
  0x2c   : > { %p839_p10 = pnand %p837_p5, %p834_p4 }
  0x2e   : > { %842 = shalt.err (!%p839_p10)
}
  0x2f   : > { %s843_s24 = scalar_lea.vmem %s1006_s27, 512  ;;  %p851_p0 = scmp.lt.s32.totalorder %s1006_s27, %s1006_s27 }
  0x30   : > { %p844_p11 = scmp.ne.s32.totalorder %s1006_s27, %s843_s24  ;;  %p852_p2 = scmp.lt.s32.totalorder %s843_s24, %s843_s24 }
  0x32   : > { %p846_p12 = pnand %p844_p11, %p804_p9  ;;  %p853_p3 = por %p852_p2, %p851_p0 }
  0x34   : > { %p847_p13 = pneg %p846_p12 }
  0x36   : > { %p854_p6 = pnand %p853_p3, %p847_p13 }
  0x38   : > { %857 = shalt.err (!%p854_p6)
}
  0x39   : > { %738 = dma.hbm_to_vmem [thread:$0]  (!%p1002_p7), %s1215_s2, 512, %s1006_s27, [#allocation5], %s930_s10, %s930_s10, %s931_s11  }
  0x3a   : > { %s1056_s7 = sadd.s32 1, %s926_s18   ;;  %s25_s8 = sadd.s32 1, %s922_s17 }
  0x3b   : > { %s22_s25 = ssub.s32 %s926_s18, %s1056_s7  ;;  %p32_p9 = scmp.ne.s32.totalorder %s922_s17, %s918_s16 }
  0x3c   : > { %p23_p8 = scmp.eq.s32.totalorder %s22_s25, 0  ;;  %p33_p1 = scmp.eq.s32.totalorder %s926_s18, 0 }
  0x3d   : > { %p745_p4 = scmp.lt.s32.totalorder %s926_s18, 4  ;;  %s180_s9 = sand.u32 1, %s922_s17  }
  0x3e   : > { %s1067_s12 = scalar_select %p23_p8, %s922_s17, %s25_s8  }
  0x3f   : > { %p34_p5 = por %p33_p1, %p32_p9  ;;  %s655_s13 = sshll.u32 %s180_s9, 6 }
  0x40   : > { %s681_s14 = sshll.u32 %s926_s18, 10  ;;  %s184_s27 = scalar_lea.vmem [#allocation2], %s655_s13 }
  0x41   : > { %s1073_s26 = scalar_lea.hbm %s1213_s0, %s681_s14  ;;  %s192_s10 = sshll.u32 %s184_s27, 4  ;;  %s1079_s10 = int_to_ptr.vmem [resolvable:$true] %s192_s10 }
  0x42   : > { %p1075_p7 = pnand %p745_p4, %p34_p5  ;;  %s1081_s28 = scalar_lea.sflag [#allocation3], %s180_s9 }
  0x43   : > { %s858_s29 = scalar_lea.hbm %s1073_s26, 1024  ;;  %s863_s5 = scalar_lea.hbm %s1213_s0, 4096 }
  0x44   : > { %p859_p10 = scmp.ne.s32.totalorder %s1073_s26, %s858_s29  ;;  %p860_p11 = pneg %p1075_p7 }
  0x45   : > { %p864_p0 = scmp.lt.u32.totalorder %s1073_s26, %s1213_s0  ;;  %p865_p2 = scmp.lt.u32.totalorder %s863_s5, %s858_s29 }
  0x46   : > { %p861_p12 = pnand %p860_p11, %p859_p10  ;;  %p867_p6 = scmp.lt.u32.totalorder %s858_s29, %s1073_s26 }
  0x47   : > { %p866_p3 = por %p865_p2, %p864_p0 }
  0x48   : > { %p862_p13 = pneg %p861_p12 }
  0x49   : > { %p868_p9 = por %p867_p6, %p866_p3 }
  0x4b   : > { %p869_p8 = pnand %p868_p9, %p862_p13 }
  0x4d   : > { %872 = shalt.err (!%p869_p8)
}
  0x4e   : > { %s873_s25 = scalar_lea.vmem %s1079_s10, 1024  ;;  %s932_s9 = smov [#allocation2]  }
  0x4f   : > { %p874_p1 = scmp.ne.s32.totalorder %s1079_s10, %s873_s25  ;;  %s878_s13 = sshll.u32 %s932_s9, 4  ;;  %s879_s13 = int_to_ptr.vmem [resolvable:$false] %s878_s13 }
  0x50   : > { %s880_s14 = scalar_lea.vmem %s879_s13, 2048  ;;  %p881_p10 = scmp.lt.s32.totalorder %s1079_s10, %s879_s13 }
  0x51   : > { %p876_p4 = pnand %p874_p1, %p860_p11  ;;  %p882_p12 = scmp.lt.s32.totalorder %s880_s14, %s873_s25 }
  0x53   : > { %p877_p5 = pneg %p876_p4  ;;  %p883_p0 = por %p882_p12, %p881_p10 }
  0x55   : > { %p884_p2 = pnand %p883_p0, %p877_p5 }
  0x57   : > { %887 = shalt.err (!%p884_p2)
}
  0x58   : > { %s933_s15 = smov 128   ;;  %s934_s23 = smov 8  }
  0x59   : > { %742 = dma.hbm_to_vmem [thread:$0]  (!%p1075_p7), %s1073_s26, 1024, %s1079_s10, %s1081_s28, %s933_s15, %s933_s15, %s934_s23  }
  0x5a   : > { %p1227_p11 = scmp.ne.s32.totalorder %s1224_s22, 0 }
  0x5b   : > { %s206_s27 = sand.u32 (!%p1227_p11), 1, %s918_s16   ;;  %p1228_p13 = scmp.ne.s32.totalorder (!%p1227_p11), %s1223_s21, 0 }
  0x5c   : > { %204 = sbr.rel (%p1227_p11) target bundleno = 521 (0x209), region = 36  ;;  %s660_s29 = sshll.u32 (!%p1227_p11), %s206_s27, 6 }
  0x5d   : > { %s207_s30 = scalar_lea.sflag (!%p1227_p11), [#allocation3], %s206_s27  ;;  %s210_s24 = scalar_lea.vmem (!%p1227_p11), [#allocation2], %s660_s29 }
  0x63   : > { %905 = dma.done.wait (%p1228_p13), %s207_s30, 1024  }
  0x64   : > { %907 = vsyncadd (%p1228_p13), %s207_s30, 4294966272  ;;  %p1229_p3 = scmp.ne.s32.totalorder %s1222_s20, 0 }
  0x66   : > { %909 = dma.done.wait (%p1229_p3), [#allocation5], 1024  }
  0x67   : > { %911 = vsyncadd (%p1229_p3), [#allocation5], 4294966272  ;;  %vm278_vm0 = vcmask 523264   ;;  %v1120_v0 = vld [vmem:[%s210_s24 + $0x8] sm:$0xff]  ;;  %v1122_v1 = vld [vmem:[%s210_s24] sm:$0xff]  ;;  %s663_s20 = sshll.u32 %s649_s19, 2 }
  0x68   : > { %v1124_v2 = vld [vmem:[%s210_s24 + $0x18] sm:$0xff]  ;;  %v291_v3 = vsel %vm278_vm0, %v1120_v0, 0.0  ;;  %v279_v4 = vsel %vm278_vm0, %v1122_v1, 0.0  ;;  %v1130_v5 = vld [vmem:[%s210_s24 + $0x10] sm:$0xff]  ;;  %v1138_v9 = vld [vmem:[%s210_s24 + $0x20] sm:$0xff]  ;;  %v307_v17 = vmul.f32 %v1122_v1, %v1122_v1  ;;  %v323_v21 = vmul.f32 %v1120_v0, %v1120_v0  ;;  %p245_p7 = scmp.lt.s32.totalorder %s663_s20, 15 }
  0x69   : > { %292 = vadd.xlane.f32.xlu1 %v291_v3  ;;  %280 = vadd.xlane.f32.xlu0 %v279_v4  ;;  %v294_v6 = vsel %vm278_vm0, %v1124_v2, 0.0  ;;  %v282_v7 = vsel %vm278_vm0, %v1130_v5, 0.0  ;;  %v1136_v8 = vld [vmem:[%s210_s24 + $0x30] sm:$0xff]  ;;  %v1142_v11 = vld [vmem:[%s210_s24 + $0x38] sm:$0xff]  ;;  %v285_v12 = vsel %vm278_vm0, %v1138_v9, 0.0  ;;  %v1146_v13 = vld [vmem:[%s210_s24 + $0x28] sm:$0xff]  ;;  %v308_v16 = vmul.f32 %v1130_v5, %v1130_v5 }
  0x6a   : > { %v288_v10 = vsel %vm278_vm0, %v1136_v8, 0.0  ;;  %v300_v14 = vsel %vm278_vm0, %v1142_v11, 0.0  ;;  %v297_v15 = vsel %vm278_vm0, %v1146_v13, 0.0  ;;  %v311_v19 = vsel %vm278_vm0, %v307_v17, 0.0  ;;  %v786_v32 = vld [vmem:[#allocation6] sm:$0xff]   ;;  %v788_v34 = vld [vmem:[#allocation6 + $0x8] sm:$0xff]  }
  0x6b   : > { %v314_v18 = vsel %vm278_vm0, %v308_v16, 0.0  ;;  %v324_v20 = vmul.f32 %v1124_v2, %v1124_v2  ;;  %v327_v23 = vsel %vm278_vm0, %v323_v21, 0.0  ;;  %v310_v24 = vmul.f32 %v1136_v8, %v1136_v8  ;;  %v787_v33 = vld [vmem:[#allocation4] sm:$0xff]   ;;  %694 = vmatprep.subr.bf16.mxu1 %v786_v32  ;;  %v789_v35 = vld [vmem:[#allocation4 + $0x8] sm:$0xff]   ;;  %v790_v36 = vld [vmem:[#allocation6 + $0x10] sm:$0xff]   ;;  %s1235_s20 = smov (!%p245_p7, %s663_s20), 15 }
  0x6c   : > { %v309_v25 = vmul.f32 %v1138_v9, %v1138_v9  ;;  %v326_v28 = vmul.f32 %v1142_v11, %v1142_v11  ;;  %v325_v29 = vmul.f32 %v1146_v13, %v1146_v13  ;;  %706 = vmatprep.subr.bf16.mxu0 %v787_v33  ;;  %695 = vmatpush3.bf16.msra.mxu1 %v786_v32  ;;  %v791_v37 = vld [vmem:[#allocation4 + $0x10] sm:$0xff]   ;;  %v792_v38 = vld [vmem:[#allocation6 + $0x18] sm:$0xff]   ;;  %s664_s21 = sshll.u32 %s1235_s20, 3 }
  0x6d   : > { %295 = vadd.xlane.f32.xlu1 %v294_v6  ;;  %283 = vadd.xlane.f32.xlu0 %v282_v7  ;;  %v330_v22 = vsel %vm278_vm0, %v324_v20, 0.0  ;;  %v320_v26 = vsel %vm278_vm0, %v310_v24, 0.0  ;;  %v793_v39 = vld [vmem:[#allocation4 + $0x18] sm:$0xff]   ;;  %s248_s28 = scalar_lea.vmem %s1217_s4, %s664_s21 }
  0x6e   : > { %v317_v27 = vsel %vm278_vm0, %v309_v25, 0.0  ;;  %v336_v30 = vsel %vm278_vm0, %v326_v28, 0.0  ;;  %v333_v31 = vsel %vm278_vm0, %v325_v29, 0.0  ;;  %707 = vmatpush3.bf16.msra.mxu0 %v787_v33  ;;  %696 = vmatprep.subr.bf16.mxu1 %v788_v34 }
  0x6f   : > { %708 = vmatprep.subr.bf16.mxu0 %v789_v35 }
  0x70   : > { %697 = vmatpush3.bf16.msra.mxu1 %v788_v34 }
  0x71   : > { %289 = vadd.xlane.f32.xlu1 %v288_v10  ;;  %286 = vadd.xlane.f32.xlu0 %v285_v12 }
  0x72   : > { %709 = vmatpush3.bf16.msra.mxu0 %v789_v35  ;;  %698 = vmatprep.subr.bf16.mxu1 %v790_v36 }
  0x73   : > { %710 = vmatprep.subr.bf16.mxu0 %v791_v37 }
  0x74   : > { %699 = vmatpush3.bf16.msra.mxu1 %v790_v36 }
  0x75   : > { %301 = vadd.xlane.f32.xlu1 %v300_v14  ;;  %298 = vadd.xlane.f32.xlu0 %v297_v15 }
  0x76   : > { %711 = vmatpush3.bf16.msra.mxu0 %v791_v37  ;;  %700 = vmatprep.subr.bf16.mxu1 %v792_v38 }
  0x77   : > { %712 = vmatprep.subr.bf16.mxu0 %v793_v39 }
  0x78   : > { %701 = vmatpush3.bf16.msra.mxu1 %v792_v38 }
  0x79   : > { %315 = vadd.xlane.f32.xlu1 %v314_v18  ;;  %312 = vadd.xlane.f32.xlu0 %v311_v19 }
  0x7a   : > { %713 = vmatpush3.bf16.msra.mxu0 %v793_v39 }
  0x7d   : > { %331 = vadd.xlane.f32.xlu1 %v330_v22  ;;  %328 = vadd.xlane.f32.xlu0 %v327_v23 }
  0x81   : > { %321 = vadd.xlane.f32.xlu1 %v320_v26  ;;  %318 = vadd.xlane.f32.xlu0 %v317_v27 }
  0x85   : > { %337 = vadd.xlane.f32.xlu1 %v336_v30  ;;  %334 = vadd.xlane.f32.xlu0 %v333_v31 }
  0xf6   : > { %v293_v40 = vpop.xlane.xlu1 %292  ;;  %v281_v41 = vpop.xlane.xlu0 %280 }
  0xf7   : > { %v303_v48 = vadd.f32 %v293_v40, %v281_v41 }
  0xf9   : > { %v343_v52 = vmul.f32 0.0078125, %v303_v48 }
  0xfa   : > { %v296_v42 = vpop.xlane.xlu1 %295  ;;  %v284_v43 = vpop.xlane.xlu0 %283 }
  0xfb   : > { %v304_v49 = vadd.f32 %v296_v42, %v284_v43  ;;  %v351_v59 = vmul.f32 %v343_v52, %v343_v52  ;;  %v381_v35 = vsub.f32 %v1120_v0, %v343_v52  ;;  %v371_v36 = vsub.f32 %v1122_v1, %v343_v52 }
  0xfd   : > { %v344_v53 = vmul.f32 0.0078125, %v304_v49 }
  0xfe   : > { %v290_v44 = vpop.xlane.xlu1 %289  ;;  %v287_v45 = vpop.xlane.xlu0 %286 }
  0xff   : > { %v352_v62 = vmul.f32 %v344_v53, %v344_v53  ;;  %v382_v32 = vsub.f32 %v1124_v2, %v344_v53  ;;  %v372_v33 = vsub.f32 %v1130_v5, %v344_v53 }
 0x102   : > { %v302_v46 = vpop.xlane.xlu1 %301  ;;  %v299_v47 = vpop.xlane.xlu0 %298 }
 0x103   : > { %v306_v58 = vadd.f32 %v302_v46, %v290_v44  ;;  %v305_v60 = vadd.f32 %v299_v47, %v287_v45 }
 0x105   : > { %v346_v10 = vmul.f32 0.0078125, %v306_v58  ;;  %v345_v12 = vmul.f32 0.0078125, %v305_v60 }
 0x106   : > { %v316_v50 = vpop.xlane.xlu1 %315  ;;  %v313_v51 = vpop.xlane.xlu0 %312 }
 0x107   : > { %v354_v22 = vmul.f32 %v346_v10, %v346_v10  ;;  %v353_v24 = vmul.f32 %v345_v12, %v345_v12  ;;  %v374_v2 = vsub.f32 %v1136_v8, %v346_v10  ;;  %v384_v5 = vsub.f32 %v1142_v11, %v346_v10 }
 0x108   : > { %v373_v0 = vsub.f32 %v1138_v9, %v345_v12  ;;  %v383_v1 = vsub.f32 %v1146_v13, %v345_v12  ;;  %v677_v9 = vld [vmem:[%s1216_s3] ss:$0 sm:$0xff] }
 0x10a   : > { %v332_v54 = vpop.xlane.xlu1 %331  ;;  %v329_v55 = vpop.xlane.xlu0 %328 }
 0x10b   : > { %v340_v56 = vadd.f32 %v332_v54, %v316_v50  ;;  %v339_v57 = vadd.f32 %v329_v55, %v313_v51 }
 0x10d   : > { %v348_v61 = vmul.f32 0.0078125, %v340_v56  ;;  %v347_v63 = vmul.f32 0.0078125, %v339_v57 }
 0x10e   : > { %v322_v3 = vpop.xlane.xlu1 %321  ;;  %v319_v4 = vpop.xlane.xlu0 %318 }
 0x10f   : > { %v356_v6 = vsub.f32 %v348_v61, %v352_v62  ;;  %v355_v7 = vsub.f32 %v347_v63, %v351_v59 }
 0x111   : > { %v360_v14 = vmax.f32 %v356_v6, 0.0  ;;  %v359_v15 = vmax.f32 %v355_v7, 0.0 }
 0x112   : > { %v338_v16 = vpop.xlane.xlu1 %337  ;;  %v335_v17 = vpop.xlane.xlu0 %334 }
 0x113   : > { %v364_v18 = vadd.f32 1e-05, %v360_v14  ;;  %v363_v19 = vadd.f32 1e-05, %v359_v15  ;;  %v342_v20 = vadd.f32 %v338_v16, %v322_v3  ;;  %v341_v21 = vadd.f32 %v335_v17, %v319_v4 }
 0x115   : > { %794 = vrsqrt.f32 %v364_v18  ;;  %v350_v23 = vmul.f32 0.0078125, %v342_v20  ;;  %v349_v25 = vmul.f32 0.0078125, %v341_v21 }
 0x116   : > { %796 = vrsqrt.f32 %v363_v19 }
 0x117   : > { %v358_v26 = vsub.f32 %v350_v23, %v354_v22  ;;  %v357_v27 = vsub.f32 %v349_v25, %v353_v24 }
 0x119   : > { %v362_v28 = vmax.f32 %v358_v26, 0.0  ;;  %v361_v29 = vmax.f32 %v357_v27, 0.0 }
 0x11b   : > { %v366_v30 = vadd.f32 1e-05, %v362_v28  ;;  %v365_v31 = vadd.f32 1e-05, %v361_v29 }
 0x11d   : > { %798 = vrsqrt.f32 %v366_v30 }
 0x11e   : > { %800 = vrsqrt.f32 %v365_v31 }
 0x11f   : > { %v795_v34 = vpop.eup %794 }
 0x120   : > { %v797_v37 = vpop.eup %796  ;;  %v386_v38 = vmul.f32 %v795_v34, %v382_v32  ;;  %v376_v39 = vmul.f32 %v795_v34, %v372_v33 }
 0x121   : > { %v385_v40 = vmul.f32 %v797_v37, %v381_v35  ;;  %v375_v41 = vmul.f32 %v797_v37, %v371_v36 }
 0x123   : > { %v389_v42 = vpack.c.bf16 %v386_v38, %v385_v40  ;;  %v379_v43 = vpack.c.bf16 %v376_v39, %v375_v41 }
 0x125   : > { %702 = vmatprep.mubr.msk.bf16.mxu1 %vm278_vm0, %v389_v42  ;;  %714 = vmatprep.mubr.msk.bf16.mxu0 %vm278_vm0, %v379_v43 }
 0x127   : > { %v799_v44 = vpop.eup %798 }
 0x128   : > { %v801_v45 = vpop.eup %800  ;;  %v388_v46 = vmul.f32 %v799_v44, %v384_v5  ;;  %v378_v47 = vmul.f32 %v799_v44, %v374_v2 }
 0x129   : > { %v387_v48 = vmul.f32 %v801_v45, %v383_v1  ;;  %v377_v49 = vmul.f32 %v801_v45, %v373_v0 }
 0x12b   : > { %v390_v50 = vpack.c.bf16 %v388_v46, %v387_v48  ;;  %v380_v51 = vpack.c.bf16 %v378_v47, %v377_v49 }
 0x12d   : > { %703 = vmatmul.mubr.msk.bf16.vlgmr.msra.gmra.mrb[0].mxu1 %vm278_vm0, %v390_v50  ;;  %715 = vmatmul.mubr.msk.bf16.vlgmr.msra.gmra.mrb[0].mxu0 %vm278_vm0, %v380_v51 }
 0x200   : > { %v704_v8 = vpop.f32.mrb[0].mxu1  ;;  %v716_v11 = vpop.f32.mrb[0].mxu0 }
 0x201   : > { %v543_v13 = vadd.f32 %v716_v11, %v704_v8  ;;  %v455_v52 = vpop.f32.mrb[1].mxu1  ;;  %v534_v53 = vpop.f32.mrb[1].mxu0 }
 0x202   : > { %v535_v54 = vadd.f32 %v534_v53, %v455_v52  ;;  %v705_v55 = vpop.f32.mrb[2].mxu1  ;;  %v717_v56 = vpop.f32.mrb[2].mxu0 }
 0x203   : > { %v557_v57 = vadd.f32 %v677_v9, %v543_v13  ;;  %v546_v58 = vadd.f32 %v717_v56, %v705_v55  ;;  %v458_v59 = vpop.f32.mrb[3].mxu1  ;;  %v537_v60 = vpop.f32.mrb[3].mxu0 }
 0x204   : > { %v555_v61 = vadd.f32 %v677_v9, %v535_v54  ;;  %v538_v62 = vadd.f32 %v537_v60, %v458_v59 }
 0x205   : > { %561 = vst.msk [vmem:[%s248_s28 + $0x10] sm:$0xff] %vm278_vm0, %v557_v57  ;;  %v558_v63 = vadd.f32 %v677_v9, %v546_v58 }
 0x206   : > { %559 = vst.msk [vmem:[%s248_s28] sm:$0xff] %vm278_vm0, %v555_v61  ;;  %v556_v3 = vadd.f32 %v677_v9, %v538_v62 }
 0x207   : > { %562 = vst.msk [vmem:[%s248_s28 + $0x18] sm:$0xff] %vm278_vm0, %v558_v63 }
 0x208   : > { %560 = vst.msk [vmem:[%s248_s28 + $0x8] sm:$0xff] %vm278_vm0, %v556_v3 }
 0x209 PF: > { %p15_p6 = scmp.ge.s32.totalorder %s1056_s7, 6   ;;  %s1230_s15 = smov %s918_s16 }
 0x20a   : > { %s1231_s16 = smov %s922_s17  ;;  %s1232_s17 = smov %s1067_s12 }
 0x20b   : > { %s1233_s18 = smov %s1056_s7  ;;  %17 = sbr.rel (!%p15_p6) target bundleno = 4 (0x4), region = 85 }
 0x212   :  { %585 = vsyncpa [#allocation3], 1 }
 0x213   :  { %587 = vsyncpa [#allocation3 + $0x1], 1 }
 0x214   :  { %588 = vsyncpa [#allocation5], 1 }

// kernel: tpu_custom_call.1
= control target key start
LH: loop header
LB: loop body
LE: loop exit
PB: predicated region body
PF: predicated region fallthrough
CT: control target
= control target key end

     0   :  { %9 = vsyncpa [#allocation3], 0  ;;  %s1213_s0 = inlined_call_operand.hbm [shape: f32[16,2,8,64], index: 0, kind: input, shape index: {}]   ;;  %s1214_s1 = inlined_call_operand.hbm [shape: bf16[64,64], index: 1, kind: input, shape index: {}]   ;;  %s1215_s2 = inlined_call_operand.hbm [shape: bf16[64,64], index: 2, kind: input, shape index: {}]   ;;  %s1216_s3 = inlined_call_operand.vmem [shape: f32[1,64], index: 3, kind: input, shape index: {}]   ;;  %s1217_s4 = inlined_call_operand.vmem [shape: f32[128,64], index: 4, kind: output, shape index: {}]  }
   0x1   :  { %11 = vsyncpa [#allocation3 + $0x1], 0 }
   0x2   :  { %12 = vsyncpa [#allocation5], 0  ;;  %s960_s15 = smov 0   ;;  %s962_s16 = smov 0  }
   0x3   :  { %s964_s17 = smov 0   ;;  %s966_s18 = smov 0  }
   0x4 LB: > { %s649_s19 = sadd.s32 4294967295, %s926_s18   ;;  %p38_p0 = scmp.ne.s32.totalorder %s918_s16, %s914_s15  ;;  %s926_s18 = sphi %s966_s18, %s1233_s18   ;;  %s922_s17 = sphi %s964_s17, %s1232_s17   ;;  %s918_s16 = sphi %s962_s16, %s1231_s16   ;;  %s914_s15 = sphi %s960_s15, %s1230_s15  }
   0x5   : > { %p982_p1 = scmp.eq.s32.totalorder %s649_s19, 0  ;;  %p651_p2 = scmp.ge.s32.totalorder %s926_s18, 1 }
   0x6   : > { %p138_p3 = scmp.lt.s32.totalorder %s926_s18, 5  ;;  %s928_s23 = smov [#allocation4]  }
   0x7   : > { %s1222_s20 = scalar_select %p982_p1, 1, 0 }
   0x8   : > { %p990_p4 = por %p982_p1, %p38_p0  ;;  %p994_p5 = pnand %p651_p2, %p138_p3 }
   0x9   : > { %s150_s24 = sshll.u32 %s928_s23, 4  ;;  %s929_s26 = smov [#allocation6]   ;;  %s151_s24 = int_to_ptr.vmem [resolvable:$true] %s150_s24 }
   0xa   : > { %s1223_s21 = scalar_select %p990_p4, 1, 0 }
   0xb   : > { %s1224_s22 = scalar_select %p994_p5, 1, 0 }
   0xc   : > { %p732_p6 = pneg %p994_p5  ;;  %s163_s27 = sshll.u32 %s929_s26, 4  ;;  %s1006_s27 = int_to_ptr.vmem [resolvable:$true] %s163_s27 }
   0xd   : > { %s802_s30 = scalar_lea.hbm %s1214_s1, 512 }
   0xe   : > { %p1002_p7 = pnand %p732_p6, %p982_p1  ;;  %p803_p8 = scmp.ne.s32.totalorder %s1214_s1, %s802_s30 }
   0xf   : > { %p809_p12 = scmp.lt.u32.totalorder %s802_s30, %s1214_s1 }
  0x10   : > { %p804_p9 = pneg %p1002_p7 }
  0x12   : > { %p805_p10 = pnand %p804_p9, %p803_p8 }
  0x14   : > { %p806_p11 = pneg %p805_p10 }
  0x16   : > { %p811_p13 = pnand %p809_p12, %p806_p11 }
  0x18   : > { %814 = shalt.err (!%p811_p13)
}
  0x19   : > { %s815_s9 = scalar_lea.vmem %s151_s24, 512  ;;  %p823_p6 = scmp.lt.s32.totalorder %s151_s24, %s151_s24 }
  0x1a   : > { %p816_p0 = scmp.ne.s32.totalorder %s151_s24, %s815_s9  ;;  %p824_p1 = scmp.lt.s32.totalorder %s815_s9, %s815_s9 }
  0x1c   : > { %p818_p2 = pnand %p816_p0, %p804_p9  ;;  %p825_p4 = por %p824_p1, %p823_p6 }
  0x1e   : > { %p819_p3 = pneg %p818_p2 }
  0x20   : > { %p826_p5 = pnand %p825_p4, %p819_p3 }
  0x22   : > { %829 = shalt.err (!%p826_p5)
}
  0x23   : > { %s930_s10 = smov 64   ;;  %s931_s11 = smov 4  }
  0x24   : > { %735 = dma.hbm_to_vmem [thread:$0]  (!%p1002_p7), %s1214_s1, 512, %s151_s24, [#allocation5], %s930_s10, %s930_s10, %s931_s11  }
  0x25   : > { %s830_s23 = scalar_lea.hbm %s1215_s2, 512 }
  0x26   : > { %p831_p8 = scmp.ne.s32.totalorder %s1215_s2, %s830_s23  ;;  %p837_p5 = scmp.lt.u32.totalorder %s830_s23, %s1215_s2 }
  0x28   : > { %p833_p1 = pnand %p831_p8, %p804_p9 }
  0x2a   : > { %p834_p4 = pneg %p833_p1 }
  0x2c   : > { %p839_p10 = pnand %p837_p5, %p834_p4 }
  0x2e   : > { %842 = shalt.err (!%p839_p10)
}
  0x2f   : > { %s843_s24 = scalar_lea.vmem %s1006_s27, 512  ;;  %p851_p0 = scmp.lt.s32.totalorder %s1006_s27, %s1006_s27 }
  0x30   : > { %p844_p11 = scmp.ne.s32.totalorder %s1006_s27, %s843_s24  ;;  %p852_p2 = scmp.lt.s32.totalorder %s843_s24, %s843_s24 }
  0x32   : > { %p846_p12 = pnand %p844_p11, %p804_p9  ;;  %p853_p3 = por %p852_p2, %p851_p0 }
  0x34   : > { %p847_p13 = pneg %p846_p12 }
  0x36   : > { %p854_p6 = pnand %p853_p3, %p847_p13 }
  0x38   : > { %857 = shalt.err (!%p854_p6)
}
  0x39   : > { %738 = dma.hbm_to_vmem [thread:$0]  (!%p1002_p7), %s1215_s2, 512, %s1006_s27, [#allocation5], %s930_s10, %s930_s10, %s931_s11  }
  0x3a   : > { %s1056_s7 = sadd.s32 1, %s926_s18   ;;  %s25_s8 = sadd.s32 1, %s922_s17 }
  0x3b   : > { %s22_s25 = ssub.s32 %s926_s18, %s1056_s7  ;;  %p32_p9 = scmp.ne.s32.totalorder %s922_s17, %s918_s16 }
  0x3c   : > { %p23_p8 = scmp.eq.s32.totalorder %s22_s25, 0  ;;  %p33_p1 = scmp.eq.s32.totalorder %s926_s18, 0 }
  0x3d   : > { %p745_p4 = scmp.lt.s32.totalorder %s926_s18, 4  ;;  %s180_s9 = sand.u32 1, %s922_s17  }
  0x3e   : > { %s1067_s12 = scalar_select %p23_p8, %s922_s17, %s25_s8  }
  0x3f   : > { %p34_p5 = por %p33_p1, %p32_p9  ;;  %s655_s13 = sshll.u32 %s180_s9, 6 }
  0x40   : > { %s681_s14 = sshll.u32 %s926_s18, 10  ;;  %s184_s27 = scalar_lea.vmem [#allocation2], %s655_s13 }
  0x41   : > { %s1073_s26 = scalar_lea.hbm %s1213_s0, %s681_s14  ;;  %s192_s10 = sshll.u32 %s184_s27, 4  ;;  %s1079_s10 = int_to_ptr.vmem [resolvable:$true] %s192_s10 }
  0x42   : > { %p1075_p7 = pnand %p745_p4, %p34_p5  ;;  %s1081_s28 = scalar_lea.sflag [#allocation3], %s180_s9 }
  0x43   : > { %s858_s29 = scalar_lea.hbm %s1073_s26, 1024  ;;  %s863_s5 = scalar_lea.hbm %s1213_s0, 4096 }
  0x44   : > { %p859_p10 = scmp.ne.s32.totalorder %s1073_s26, %s858_s29  ;;  %p860_p11 = pneg %p1075_p7 }
  0x45   : > { %p864_p0 = scmp.lt.u32.totalorder %s1073_s26, %s1213_s0  ;;  %p865_p2 = scmp.lt.u32.totalorder %s863_s5, %s858_s29 }
  0x46   : > { %p861_p12 = pnand %p860_p11, %p859_p10  ;;  %p867_p6 = scmp.lt.u32.totalorder %s858_s29, %s1073_s26 }
  0x47   : > { %p866_p3 = por %p865_p2, %p864_p0 }
  0x48   : > { %p862_p13 = pneg %p861_p12 }
  0x49   : > { %p868_p9 = por %p867_p6, %p866_p3 }
  0x4b   : > { %p869_p8 = pnand %p868_p9, %p862_p13 }
  0x4d   : > { %872 = shalt.err (!%p869_p8)
}
  0x4e   : > { %s873_s25 = scalar_lea.vmem %s1079_s10, 1024  ;;  %s932_s9 = smov [#allocation2]  }
  0x4f   : > { %p874_p1 = scmp.ne.s32.totalorder %s1079_s10, %s873_s25  ;;  %s878_s13 = sshll.u32 %s932_s9, 4  ;;  %s879_s13 = int_to_ptr.vmem [resolvable:$false] %s878_s13 }
  0x50   : > { %s880_s14 = scalar_lea.vmem %s879_s13, 2048  ;;  %p881_p10 = scmp.lt.s32.totalorder %s1079_s10, %s879_s13 }
  0x51   : > { %p876_p4 = pnand %p874_p1, %p860_p11  ;;  %p882_p12 = scmp.lt.s32.totalorder %s880_s14, %s873_s25 }
  0x53   : > { %p877_p5 = pneg %p876_p4  ;;  %p883_p0 = por %p882_p12, %p881_p10 }
  0x55   : > { %p884_p2 = pnand %p883_p0, %p877_p5 }
  0x57   : > { %887 = shalt.err (!%p884_p2)
}
  0x58   : > { %s933_s15 = smov 128   ;;  %s934_s23 = smov 8  }
  0x59   : > { %742 = dma.hbm_to_vmem [thread:$0]  (!%p1075_p7), %s1073_s26, 1024, %s1079_s10, %s1081_s28, %s933_s15, %s933_s15, %s934_s23  }
  0x5a   : > { %p1227_p11 = scmp.ne.s32.totalorder %s1224_s22, 0 }
  0x5b   : > { %s206_s27 = sand.u32 (!%p1227_p11), 1, %s918_s16   ;;  %p1228_p13 = scmp.ne.s32.totalorder (!%p1227_p11), %s1223_s21, 0 }
  0x5c   : > { %204 = sbr.rel (%p1227_p11) target bundleno = 521 (0x209), region = 36  ;;  %s660_s29 = sshll.u32 (!%p1227_p11), %s206_s27, 6 }
  0x5d   : > { %s207_s30 = scalar_lea.sflag (!%p1227_p11), [#allocation3], %s206_s27  ;;  %s210_s24 = scalar_lea.vmem (!%p1227_p11), [#allocation2], %s660_s29 }
  0x63   : > { %905 = dma.done.wait (%p1228_p13), %s207_s30, 1024  }
  0x64   : > { %907 = vsyncadd (%p1228_p13), %s207_s30, 4294966272  ;;  %p1229_p3 = scmp.ne.s32.totalorder %s1222_s20, 0 }
  0x66   : > { %909 = dma.done.wait (%p1229_p3), [#allocation5], 1024  }
  0x67   : > { %911 = vsyncadd (%p1229_p3), [#allocation5], 4294966272  ;;  %vm278_vm0 = vcmask 523264   ;;  %v1120_v0 = vld [vmem:[%s210_s24 + $0x8] sm:$0xff]  ;;  %v1122_v1 = vld [vmem:[%s210_s24] sm:$0xff]  ;;  %s663_s20 = sshll.u32 %s649_s19, 2 }
  0x68   : > { %v1124_v2 = vld [vmem:[%s210_s24 + $0x18] sm:$0xff]  ;;  %v291_v3 = vsel %vm278_vm0, %v1120_v0, 0.0  ;;  %v279_v4 = vsel %vm278_vm0, %v1122_v1, 0.0  ;;  %v1130_v5 = vld [vmem:[%s210_s24 + $0x10] sm:$0xff]  ;;  %v1138_v9 = vld [vmem:[%s210_s24 + $0x20] sm:$0xff]  ;;  %v307_v17 = vmul.f32 %v1122_v1, %v1122_v1  ;;  %v323_v21 = vmul.f32 %v1120_v0, %v1120_v0  ;;  %p245_p7 = scmp.lt.s32.totalorder %s663_s20, 15 }
  0x69   : > { %292 = vadd.xlane.f32.xlu1 %v291_v3  ;;  %280 = vadd.xlane.f32.xlu0 %v279_v4  ;;  %v294_v6 = vsel %vm278_vm0, %v1124_v2, 0.0  ;;  %v282_v7 = vsel %vm278_vm0, %v1130_v5, 0.0  ;;  %v1136_v8 = vld [vmem:[%s210_s24 + $0x30] sm:$0xff]  ;;  %v1142_v11 = vld [vmem:[%s210_s24 + $0x38] sm:$0xff]  ;;  %v285_v12 = vsel %vm278_vm0, %v1138_v9, 0.0  ;;  %v1146_v13 = vld [vmem:[%s210_s24 + $0x28] sm:$0xff]  ;;  %v308_v16 = vmul.f32 %v1130_v5, %v1130_v5 }
  0x6a   : > { %v288_v10 = vsel %vm278_vm0, %v1136_v8, 0.0  ;;  %v300_v14 = vsel %vm278_vm0, %v1142_v11, 0.0  ;;  %v297_v15 = vsel %vm278_vm0, %v1146_v13, 0.0  ;;  %v311_v19 = vsel %vm278_vm0, %v307_v17, 0.0  ;;  %v786_v32 = vld [vmem:[#allocation6] sm:$0xff]   ;;  %v788_v34 = vld [vmem:[#allocation6 + $0x8] sm:$0xff]  }
  0x6b   : > { %v314_v18 = vsel %vm278_vm0, %v308_v16, 0.0  ;;  %v324_v20 = vmul.f32 %v1124_v2, %v1124_v2  ;;  %v327_v23 = vsel %vm278_vm0, %v323_v21, 0.0  ;;  %v310_v24 = vmul.f32 %v1136_v8, %v1136_v8  ;;  %v787_v33 = vld [vmem:[#allocation4] sm:$0xff]   ;;  %694 = vmatprep.subr.bf16.mxu1 %v786_v32  ;;  %v789_v35 = vld [vmem:[#allocation4 + $0x8] sm:$0xff]   ;;  %v790_v36 = vld [vmem:[#allocation6 + $0x10] sm:$0xff]   ;;  %s1235_s20 = smov (!%p245_p7, %s663_s20), 15 }
  0x6c   : > { %v309_v25 = vmul.f32 %v1138_v9, %v1138_v9  ;;  %v326_v28 = vmul.f32 %v1142_v11, %v1142_v11  ;;  %v325_v29 = vmul.f32 %v1146_v13, %v1146_v13  ;;  %706 = vmatprep.subr.bf16.mxu0 %v787_v33  ;;  %695 = vmatpush3.bf16.msra.mxu1 %v786_v32  ;;  %v791_v37 = vld [vmem:[#allocation4 + $0x10] sm:$0xff]   ;;  %v792_v38 = vld [vmem:[#allocation6 + $0x18] sm:$0xff]   ;;  %s664_s21 = sshll.u32 %s1235_s20, 3 }
  0x6d   : > { %295 = vadd.xlane.f32.xlu1 %v294_v6  ;;  %283 = vadd.xlane.f32.xlu0 %v282_v7  ;;  %v330_v22 = vsel %vm278_vm0, %v324_v20, 0.0  ;;  %v320_v26 = vsel %vm278_vm0, %v310_v24, 0.0  ;;  %v793_v39 = vld [vmem:[#allocation4 + $0x18] sm:$0xff]   ;;  %s248_s28 = scalar_lea.vmem %s1217_s4, %s664_s21 }
  0x6e   : > { %v317_v27 = vsel %vm278_vm0, %v309_v25, 0.0  ;;  %v336_v30 = vsel %vm278_vm0, %v326_v28, 0.0  ;;  %v333_v31 = vsel %vm278_vm0, %v325_v29, 0.0  ;;  %707 = vmatpush3.bf16.msra.mxu0 %v787_v33  ;;  %696 = vmatprep.subr.bf16.mxu1 %v788_v34 }
  0x6f   : > { %708 = vmatprep.subr.bf16.mxu0 %v789_v35 }
  0x70   : > { %697 = vmatpush3.bf16.msra.mxu1 %v788_v34 }
  0x71   : > { %289 = vadd.xlane.f32.xlu1 %v288_v10  ;;  %286 = vadd.xlane.f32.xlu0 %v285_v12 }
  0x72   : > { %709 = vmatpush3.bf16.msra.mxu0 %v789_v35  ;;  %698 = vmatprep.subr.bf16.mxu1 %v790_v36 }
  0x73   : > { %710 = vmatprep.subr.bf16.mxu0 %v791_v37 }
  0x74   : > { %699 = vmatpush3.bf16.msra.mxu1 %v790_v36 }
  0x75   : > { %301 = vadd.xlane.f32.xlu1 %v300_v14  ;;  %298 = vadd.xlane.f32.xlu0 %v297_v15 }
  0x76   : > { %711 = vmatpush3.bf16.msra.mxu0 %v791_v37  ;;  %700 = vmatprep.subr.bf16.mxu1 %v792_v38 }
  0x77   : > { %712 = vmatprep.subr.bf16.mxu0 %v793_v39 }
  0x78   : > { %701 = vmatpush3.bf16.msra.mxu1 %v792_v38 }
  0x79   : > { %315 = vadd.xlane.f32.xlu1 %v314_v18  ;;  %312 = vadd.xlane.f32.xlu0 %v311_v19 }
  0x7a   : > { %713 = vmatpush3.bf16.msra.mxu0 %v793_v39 }
  0x7d   : > { %331 = vadd.xlane.f32.xlu1 %v330_v22  ;;  %328 = vadd.xlane.f32.xlu0 %v327_v23 }
  0x81   : > { %321 = vadd.xlane.f32.xlu1 %v320_v26  ;;  %318 = vadd.xlane.f32.xlu0 %v317_v27 }
  0x85   : > { %337 = vadd.xlane.f32.xlu1 %v336_v30  ;;  %334 = vadd.xlane.f32.xlu0 %v333_v31 }
  0xf6   : > { %v293_v40 = vpop.xlane.xlu1 %292  ;;  %v281_v41 = vpop.xlane.xlu0 %280 }
  0xf7   : > { %v303_v48 = vadd.f32 %v293_v40, %v281_v41 }
  0xf9   : > { %v343_v52 = vmul.f32 0.0078125, %v303_v48 }
  0xfa   : > { %v296_v42 = vpop.xlane.xlu1 %295  ;;  %v284_v43 = vpop.xlane.xlu0 %283 }
  0xfb   : > { %v304_v49 = vadd.f32 %v296_v42, %v284_v43  ;;  %v351_v59 = vmul.f32 %v343_v52, %v343_v52  ;;  %v381_v35 = vsub.f32 %v1120_v0, %v343_v52  ;;  %v371_v36 = vsub.f32 %v1122_v1, %v343_v52 }
  0xfd   : > { %v344_v53 = vmul.f32 0.0078125, %v304_v49 }
  0xfe   : > { %v290_v44 = vpop.xlane.xlu1 %289  ;;  %v287_v45 = vpop.xlane.xlu0 %286 }
  0xff   : > { %v352_v62 = vmul.f32 %v344_v53, %v344_v53  ;;  %v382_v32 = vsub.f32 %v1124_v2, %v344_v53  ;;  %v372_v33 = vsub.f32 %v1130_v5, %v344_v53 }
 0x102   : > { %v302_v46 = vpop.xlane.xlu1 %301  ;;  %v299_v47 = vpop.xlane.xlu0 %298 }
 0x103   : > { %v306_v58 = vadd.f32 %v302_v46, %v290_v44  ;;  %v305_v60 = vadd.f32 %v299_v47, %v287_v45 }
 0x105   : > { %v346_v10 = vmul.f32 0.0078125, %v306_v58  ;;  %v345_v12 = vmul.f32 0.0078125, %v305_v60 }
 0x106   : > { %v316_v50 = vpop.xlane.xlu1 %315  ;;  %v313_v51 = vpop.xlane.xlu0 %312 }
 0x107   : > { %v354_v22 = vmul.f32 %v346_v10, %v346_v10  ;;  %v353_v24 = vmul.f32 %v345_v12, %v345_v12  ;;  %v374_v2 = vsub.f32 %v1136_v8, %v346_v10  ;;  %v384_v5 = vsub.f32 %v1142_v11, %v346_v10 }
 0x108   : > { %v373_v0 = vsub.f32 %v1138_v9, %v345_v12  ;;  %v383_v1 = vsub.f32 %v1146_v13, %v345_v12  ;;  %v677_v9 = vld [vmem:[%s1216_s3] ss:$0 sm:$0xff] }
 0x10a   : > { %v332_v54 = vpop.xlane.xlu1 %331  ;;  %v329_v55 = vpop.xlane.xlu0 %328 }
 0x10b   : > { %v340_v56 = vadd.f32 %v332_v54, %v316_v50  ;;  %v339_v57 = vadd.f32 %v329_v55, %v313_v51 }
 0x10d   : > { %v348_v61 = vmul.f32 0.0078125, %v340_v56  ;;  %v347_v63 = vmul.f32 0.0078125, %v339_v57 }
 0x10e   : > { %v322_v3 = vpop.xlane.xlu1 %321  ;;  %v319_v4 = vpop.xlane.xlu0 %318 }
 0x10f   : > { %v356_v6 = vsub.f32 %v348_v61, %v352_v62  ;;  %v355_v7 = vsub.f32 %v347_v63, %v351_v59 }
 0x111   : > { %v360_v14 = vmax.f32 %v356_v6, 0.0  ;;  %v359_v15 = vmax.f32 %v355_v7, 0.0 }
 0x112   : > { %v338_v16 = vpop.xlane.xlu1 %337  ;;  %v335_v17 = vpop.xlane.xlu0 %334 }
 0x113   : > { %v364_v18 = vadd.f32 1e-05, %v360_v14  ;;  %v363_v19 = vadd.f32 1e-05, %v359_v15  ;;  %v342_v20 = vadd.f32 %v338_v16, %v322_v3  ;;  %v341_v21 = vadd.f32 %v335_v17, %v319_v4 }
 0x115   : > { %794 = vrsqrt.f32 %v364_v18  ;;  %v350_v23 = vmul.f32 0.0078125, %v342_v20  ;;  %v349_v25 = vmul.f32 0.0078125, %v341_v21 }
 0x116   : > { %796 = vrsqrt.f32 %v363_v19 }
 0x117   : > { %v358_v26 = vsub.f32 %v350_v23, %v354_v22  ;;  %v357_v27 = vsub.f32 %v349_v25, %v353_v24 }
 0x119   : > { %v362_v28 = vmax.f32 %v358_v26, 0.0  ;;  %v361_v29 = vmax.f32 %v357_v27, 0.0 }
 0x11b   : > { %v366_v30 = vadd.f32 1e-05, %v362_v28  ;;  %v365_v31 = vadd.f32 1e-05, %v361_v29 }
 0x11d   : > { %798 = vrsqrt.f32 %v366_v30 }
 0x11e   : > { %800 = vrsqrt.f32 %v365_v31 }
 0x11f   : > { %v795_v34 = vpop.eup %794 }
 0x120   : > { %v797_v37 = vpop.eup %796  ;;  %v386_v38 = vmul.f32 %v795_v34, %v382_v32  ;;  %v376_v39 = vmul.f32 %v795_v34, %v372_v33 }
 0x121   : > { %v385_v40 = vmul.f32 %v797_v37, %v381_v35  ;;  %v375_v41 = vmul.f32 %v797_v37, %v371_v36 }
 0x123   : > { %v389_v42 = vpack.c.bf16 %v386_v38, %v385_v40  ;;  %v379_v43 = vpack.c.bf16 %v376_v39, %v375_v41 }
 0x125   : > { %702 = vmatprep.mubr.msk.bf16.mxu1 %vm278_vm0, %v389_v42  ;;  %714 = vmatprep.mubr.msk.bf16.mxu0 %vm278_vm0, %v379_v43 }
 0x127   : > { %v799_v44 = vpop.eup %798 }
 0x128   : > { %v801_v45 = vpop.eup %800  ;;  %v388_v46 = vmul.f32 %v799_v44, %v384_v5  ;;  %v378_v47 = vmul.f32 %v799_v44, %v374_v2 }
 0x129   : > { %v387_v48 = vmul.f32 %v801_v45, %v383_v1  ;;  %v377_v49 = vmul.f32 %v801_v45, %v373_v0 }
 0x12b   : > { %v390_v50 = vpack.c.bf16 %v388_v46, %v387_v48  ;;  %v380_v51 = vpack.c.bf16 %v378_v47, %v377_v49 }
 0x12d   : > { %703 = vmatmul.mubr.msk.bf16.vlgmr.msra.gmra.mrb[0].mxu1 %vm278_vm0, %v390_v50  ;;  %715 = vmatmul.mubr.msk.bf16.vlgmr.msra.gmra.mrb[0].mxu0 %vm278_vm0, %v380_v51 }
 0x200   : > { %v704_v8 = vpop.f32.mrb[0].mxu1  ;;  %v716_v11 = vpop.f32.mrb[0].mxu0 }
 0x201   : > { %v543_v13 = vadd.f32 %v716_v11, %v704_v8  ;;  %v455_v52 = vpop.f32.mrb[1].mxu1  ;;  %v534_v53 = vpop.f32.mrb[1].mxu0 }
 0x202   : > { %v535_v54 = vadd.f32 %v534_v53, %v455_v52  ;;  %v705_v55 = vpop.f32.mrb[2].mxu1  ;;  %v717_v56 = vpop.f32.mrb[2].mxu0 }
 0x203   : > { %v557_v57 = vadd.f32 %v677_v9, %v543_v13  ;;  %v546_v58 = vadd.f32 %v717_v56, %v705_v55  ;;  %v458_v59 = vpop.f32.mrb[3].mxu1  ;;  %v537_v60 = vpop.f32.mrb[3].mxu0 }
 0x204   : > { %v555_v61 = vadd.f32 %v677_v9, %v535_v54  ;;  %v538_v62 = vadd.f32 %v537_v60, %v458_v59 }
 0x205   : > { %561 = vst.msk [vmem:[%s248_s28 + $0x10] sm:$0xff] %vm278_vm0, %v557_v57  ;;  %v558_v63 = vadd.f32 %v677_v9, %v546_v58 }
 0x206   : > { %559 = vst.msk [vmem:[%s248_s28] sm:$0xff] %vm278_vm0, %v555_v61  ;;  %v556_v3 = vadd.f32 %v677_v9, %v538_v62 }
 0x207   : > { %562 = vst.msk [vmem:[%s248_s28 + $0x18] sm:$0xff] %vm278_vm0, %v558_v63 }
 0x208   : > { %560 = vst.msk [vmem:[%s248_s28 + $0x8] sm:$0xff] %vm278_vm0, %v556_v3 }
 0x209 PF: > { %p15_p6 = scmp.ge.s32.totalorder %s1056_s7, 6   ;;  %s1230_s15 = smov %s918_s16 }
 0x20a   : > { %s1231_s16 = smov %s922_s17  ;;  %s1232_s17 = smov %s1067_s12 }
 0x20b   : > { %s1233_s18 = smov %s1056_s7  ;;  %17 = sbr.rel (!%p15_p6) target bundleno = 4 (0x4), region = 85 }
 0x212   :  { %585 = vsyncpa [#allocation3], 1 }
 0x213   :  { %587 = vsyncpa [#allocation3 + $0x1], 1 }
 0x214   :  { %588 = vsyncpa [#allocation5], 1 }

</bundles_post_ra>
